<compile_context>
chip_gen: v6e
topology: v6e:2x2x1
jax: 0.10.0
libtpu: 0.0.40
codegen_flags: <defaults>
</compile_context>

<pallas_src>
import functools

import jax
import jax.numpy as jnp
from jax.experimental import pallas as pl
from jax.experimental.pallas import tpu as pltpu

DELTA = 0.7
GAMMA = 0.75
EPSILON = 1e-07

# 4096 rows x 128 lanes x 2 channels x 4 B = 4 MiB per input block;
# 2 inputs x 2 pipeline buffers -> 16 MiB of VMEM input buffers per step.
MAX_TILE_ROWS = 4096
_VMEM_LIMIT_BYTES = 40 * 1024 * 1024  # below v7x's 64 MiB physical per-TC VMEM
_TINY_BYTES = 1 << 20                 # pure-JAX fallback threshold


def _aftl_partial_kernel(yp_ref, yt_ref, part_ref, *, hw, row_tile, n_inner,
                         needs_mask):
    """Accumulate per-(batch, channel) [tp, fn, fp] partial sums.

    Block shapes: yp_ref / yt_ref: (1, 2, row_tile, 128); part_ref: (1, 1, 2, 3).
    Grid: (N, P, n_inner); the last (reduction) axis is "arbitrary".
    """
    t = pl.program_id(2)

    @pl.when(t == 0)
    def _():
        part_ref[...] = jnp.zeros_like(part_ref)

    yp = yp_ref[0].astype(jnp.float32)            # (2, row_tile, 128)
    yt = yt_ref[0].astype(jnp.float32)            # (2, row_tile, 128)
    yp = jnp.clip(yp, EPSILON, 1.0 - EPSILON)     # torch.clamp(y_pred, eps, 1-eps)

    if needs_mask:
        # Mask lanes/rows beyond the true H*W extent (covers both the wrapper's
        # pad-to-128 and Pallas' padding of the final partial row-tile).
        p_idx = pl.program_id(1)
        base_row = (p_idx * n_inner + t) * row_tile
        row = jax.lax.broadcasted_iota(jnp.int32, (row_tile, 128), 0) + base_row
        lane = jax.lax.broadcasted_iota(jnp.int32, (row_tile, 128), 1)
        valid = (row * 128 + lane) < hw           # (row_tile, 128)
        valid = valid[None]                       # broadcast over channels
        yp = jnp.where(valid, yp, 0.0)
        yt = jnp.where(valid, yt, 0.0)

    tp = yt * yp
    fn = yt * (1.0 - yp)                          # accumulate directly (no s_t - tp)
    fp = (1.0 - yt) * yp

    def _rsum(x):                                 # (2, row_tile, 128) -> (2, 1)
        return jnp.sum(jnp.sum(x, axis=1), axis=-1, keepdims=True)

    part_ref[0, 0] += jnp.concatenate([_rsum(tp), _rsum(fn), _rsum(fp)], axis=-1)


def _reference_loss(y_pred, y_true):
    """Pure-JAX reference mirroring the PyTorch forward (also the tiny-input path)."""
    yp = jnp.clip(y_pred.astype(jnp.float32), EPSILON, 1.0 - EPSILON)
    yt = y_true.astype(jnp.float32)
    tp = jnp.sum(yt * yp, axis=(2, 3))
    fn = jnp.sum(yt * (1.0 - yp), axis=(2, 3))
    fp = jnp.sum((1.0 - yt) * yp, axis=(2, 3))
    dice = (tp + EPSILON) / (tp + DELTA * fn + (1.0 - DELTA) * fp + EPSILON)
    back = 1.0 - dice[:, 0]
    fore = (1.0 - dice[:, 1]) * jnp.power(1.0 - dice[:, 1], -GAMMA)
    return jnp.mean(jnp.stack([back, fore], axis=-1))


@functools.partial(jax.jit, static_argnames=("force_pallas",))
def asymmetric_focal_tversky_loss(y_pred, y_true, *, force_pallas=False):
    """y_pred, y_true: (N, C, H, W); channel 0 = background, channel 1 = foreground."""
    assert y_pred.ndim == 4 and y_pred.shape == y_true.shape
    N, C, H, W = y_pred.shape
    assert C >= 2, "binary segmentation expects at least 2 channels"
    hw = H * W

    # Tiny inputs: pallas_call launch + per-step overhead dominates; XLA fusion
    # is already optimal there.
    if not force_pallas and N * 2 * hw * 4 < _TINY_BYTES:
        return _reference_loss(y_pred, y_true)

    if hw % 128 == 0:
        # Free (bitcast) reshape to a lane-dense 4D view; the kernel's channel
        # window (block of 2 at index 0) reads only channels 0/1 from HBM.
        yp4 = y_pred.reshape(N, C, hw // 128, 128)
        yt4 = y_true.reshape(N, C, hw // 128, 128)
    else:
        # TODO(synk): fuse this pad into the kernel (tail-tile DMA of the ragged
        # remainder) to avoid one extra HBM pass for non-128-multiple H*W.
        pad = (-hw) % 128
        yp4 = jnp.pad(y_pred[:, :2].reshape(N, 2, hw), ((0, 0), (0, 0), (0, pad)))
        yt4 = jnp.pad(y_true[:, :2].reshape(N, 2, hw), ((0, 0), (0, 0), (0, pad)))
        yp4 = yp4.reshape(N, 2, -1, 128)
        yt4 = yt4.reshape(N, 2, -1, 128)

    R = yp4.shape[2]
    row_tile = R if R <= MAX_TILE_ROWS else MAX_TILE_ROWS  # full dim or 8-aligned
    n_tiles = pl.cdiv(R, row_tile)
    needs_mask = (R % row_tile != 0) or (hw % 128 != 0)

    # Guarantee a parallel grid axis >= 2 so both v7x TensorCores are fed even
    # when N == 1 (no effect on v5e/v6e, which have one TC).
    P = 2 if (N == 1 and n_tiles >= 2 and n_tiles % 2 == 0) else 1
    n_inner = n_tiles // P

    kernel = functools.partial(
        _aftl_partial_kernel,
        hw=hw, row_tile=row_tile, n_inner=n_inner, needs_mask=needs_mask)

    partials = pl.pallas_call(
        kernel,
        out_shape=jax.ShapeDtypeStruct((N, P, 2, 3), jnp.float32),
        grid=(N, P, n_inner),
        in_specs=[
            pl.BlockSpec((1, 2, row_tile, 128),
                         lambda n, p, t: (n, 0, p * n_inner + t, 0)),
            pl.BlockSpec((1, 2, row_tile, 128),
                         lambda n, p, t: (n, 0, p * n_inner + t, 0)),
        ],
        out_specs=pl.BlockSpec((1, 1, 2, 3), lambda n, p, t: (n, p, 0, 0)),
        compiler_params=pltpu.CompilerParams(
            dimension_semantics=("parallel", "parallel", "arbitrary"),
            vmem_limit_bytes=_VMEM_LIMIT_BYTES,
        ),
    )(yp4, yt4)

    sums = jnp.sum(partials, axis=1)              # (N, 2, 3): combine the P slices
    tp = sums[:, :, 0]
    fn = sums[:, :, 1]
    fp = sums[:, :, 2]
    dice = (tp + EPSILON) / (tp + DELTA * fn + (1.0 - DELTA) * fp + EPSILON)

    back = 1.0 - dice[:, 0]
    # Faithful to the PyTorch forward: (1-d) * (1-d)**(-gamma). Inherently NaN
    # only if dice == 1.0 exactly (same as the reference).
    fore = (1.0 - dice[:, 1]) * jnp.power(1.0 - dice[:, 1], -GAMMA)
    return jnp.mean(jnp.stack([back, fore], axis=-1))


def _make_inputs(key, n, c, h, w):
    k1, k2 = jax.random.split(key)
    y_pred = jax.nn.sigmoid(jax.random.normal(k1, (n, c, h, w), jnp.float32))
    fg = (jax.random.uniform(k2, (n, 1, h, w)) > 0.5).astype(jnp.float32)
    extra = jnp.zeros((n, c - 2, h, w), jnp.float32)
    y_true = jnp.concatenate([1.0 - fg, fg, extra], axis=1)
    return y_pred, y_true


if __name__ == "__main__":
    key = jax.random.PRNGKey(0)
    k1, k2 = jax.random.split(key)

    # Test 1: small shapes (module's canonical use), C > 2 exercises the
    # in-kernel channel window; force the Pallas path despite tiny size.
    y_pred, y_true = _make_inputs(k1, 2, 4, 16, 16)
    loss = asymmetric_focal_tversky_loss(y_pred, y_true, force_pallas=True)
    loss = jax.block_until_ready(loss)
    ref = _reference_loss(y_pred, y_true)
    assert jnp.allclose(loss, ref, rtol=1e-5, atol=1e-6), (loss, ref)

    # Test 2: N == 1 (parallel tile-split), H*W not a multiple of 128
    # (pad + masked tail tile), multiple row tiles.
    y_pred2, y_true2 = _make_inputs(k2, 1, 3, 726, 726)
    loss2 = asymmetric_focal_tversky_loss(y_pred2, y_true2)
    loss2 = jax.block_until_ready(loss2)
    ref2 = _reference_loss(y_pred2, y_true2)
    assert jnp.allclose(loss2, ref2, rtol=1e-5, atol=1e-6), (loss2, ref2)

    print("KERNEL_OK")
</pallas_src>

<mosaic_0001>
module attributes {stable_mosaic.version = 11 : i64} {
  func.func @_aftl_partial_kernel(%arg0: i32, %arg1: i32, %arg2: i32, %arg3: memref<1x2x2x128xf32, #tpu.memory_space<vmem>>, %arg4: memref<1x2x2x128xf32, #tpu.memory_space<vmem>>, %arg5: memref<1x1x2x3xf32, #tpu.memory_space<vmem>>) attributes {dimension_semantics = [#tpu.dimension_semantics<parallel>, #tpu.dimension_semantics<parallel>, #tpu.dimension_semantics<arbitrary>], iteration_bounds = array<i64: 2, 1, 1>, scalar_prefetch = 0 : i64, scratch_operands = 0 : i64, tpu.core_type = #tpu.core_type<tc>, window_params = [{transform_indices = @transform_0, window_bounds = array<i64: 1, 2, 2, 128>}, {transform_indices = @transform_1, window_bounds = array<i64: 1, 2, 2, 128>}, {transform_indices = @transform_2, window_bounds = array<i64: 1, 1, 2, 3>}]} {
    %c0_i32 = arith.constant 0 : i32
    %0 = arith.cmpi eq, %arg2, %c0_i32 : i32
    %1 = arith.extui %0 : i1 to i32
    %c0_i32_0 = arith.constant 0 : i32
    %2 = arith.cmpi ne, %1, %c0_i32_0 : i32
    scf.if %2 {
      %cst_25 = arith.constant 0.000000e+00 : f32
      %34 = vector.broadcast %cst_25 : f32 to vector<1x1x2x3xf32>
      %c0_26 = arith.constant 0 : index
      %c0_27 = arith.constant 0 : index
      %c0_28 = arith.constant 0 : index
      %c0_29 = arith.constant 0 : index
      %35 = vector.load %arg5[%c0_26, %c0_27, %c0_28, %c0_29] : memref<1x1x2x3xf32, #tpu.memory_space<vmem>>, vector<1x1x2x3xf32>
      tpu.vector_store %arg5[%c0_26, %c0_27, %c0_28, %c0_29], %34 {strides = array<i32>} : memref<1x1x2x3xf32, #tpu.memory_space<vmem>>, vector<1x1x2x3xf32>,
    } else {
    }
    %c0 = arith.constant 0 : index
    %c0_1 = arith.constant 0 : index
    %c0_2 = arith.constant 0 : index
    %c0_3 = arith.constant 0 : index
    %3 = vector.load %arg3[%c0, %c0_1, %c0_2, %c0_3] : memref<1x2x2x128xf32, #tpu.memory_space<vmem>>, vector<1x2x2x128xf32>
    %4 = vector.shape_cast %3 : vector<1x2x2x128xf32> to vector<2x2x128xf32>
    %c0_4 = arith.constant 0 : index
    %c0_5 = arith.constant 0 : index
    %c0_6 = arith.constant 0 : index
    %c0_7 = arith.constant 0 : index
    %5 = vector.load %arg4[%c0_4, %c0_5, %c0_6, %c0_7] : memref<1x2x2x128xf32, #tpu.memory_space<vmem>>, vector<1x2x2x128xf32>
    %6 = vector.shape_cast %5 : vector<1x2x2x128xf32> to vector<2x2x128xf32>
    %cst = arith.constant 1.000000e-07 : f32
    %cst_8 = arith.constant 0.99999988 : f32
    %7 = vector.broadcast %cst : f32 to vector<2x2x128xf32>
    %8 = arith.maximumf %7, %4 : vector<2x2x128xf32>
    %9 = vector.broadcast %cst_8 : f32 to vector<2x2x128xf32>
    %10 = arith.minimumf %9, %8 : vector<2x2x128xf32>
    %11 = arith.mulf %6, %10 : vector<2x2x128xf32>
    %cst_9 = arith.constant 1.000000e+00 : f32
    %12 = vector.broadcast %cst_9 : f32 to vector<2x2x128xf32>
    %13 = arith.subf %12, %10 : vector<2x2x128xf32>
    %14 = arith.mulf %6, %13 : vector<2x2x128xf32>
    %cst_10 = arith.constant 1.000000e+00 : f32
    %15 = vector.broadcast %cst_10 : f32 to vector<2x2x128xf32>
    %16 = arith.subf %15, %6 : vector<2x2x128xf32>
    %17 = arith.mulf %16, %10 : vector<2x2x128xf32>
    %c0_11 = arith.constant 0 : index
    %c0_12 = arith.constant 0 : index
    %c0_13 = arith.constant 0 : index
    %c0_14 = arith.constant 0 : index
    %18 = vector.load %arg5[%c0_11, %c0_12, %c0_13, %c0_14] : memref<1x1x2x3xf32, #tpu.memory_space<vmem>>, vector<1x1x2x3xf32>
    %19 = vector.shape_cast %18 : vector<1x1x2x3xf32> to vector<2x3xf32>
    %cst_15 = arith.constant dense<0.000000e+00> : vector<2x128xf32>
    %20 = vector.multi_reduction <add>, %11, %cst_15 [1] : vector<2x2x128xf32> to vector<2x128xf32>
    %cst_16 = arith.constant dense<0.000000e+00> : vector<2xf32>
    %21 = vector.multi_reduction <add>, %20, %cst_16 [1] : vector<2x128xf32> to vector<2xf32>
    %22 = vector.shape_cast %21 : vector<2xf32> to vector<2x1xf32>
    %cst_17 = arith.constant dense<0.000000e+00> : vector<2x128xf32>
    %23 = vector.multi_reduction <add>, %14, %cst_17 [1] : vector<2x2x128xf32> to vector<2x128xf32>
    %cst_18 = arith.constant dense<0.000000e+00> : vector<2xf32>
    %24 = vector.multi_reduction <add>, %23, %cst_18 [1] : vector<2x128xf32> to vector<2xf32>
    %25 = vector.shape_cast %24 : vector<2xf32> to vector<2x1xf32>
    %cst_19 = arith.constant dense<0.000000e+00> : vector<2x128xf32>
    %26 = vector.multi_reduction <add>, %17, %cst_19 [1] : vector<2x2x128xf32> to vector<2x128xf32>
    %cst_20 = arith.constant dense<0.000000e+00> : vector<2xf32>
    %27 = vector.multi_reduction <add>, %26, %cst_20 [1] : vector<2x128xf32> to vector<2xf32>
    %28 = vector.shape_cast %27 : vector<2xf32> to vector<2x1xf32>
    %29 = tpu.concatenate %22, %25, %28 in 1 : vector<2x1xf32>, vector<2x1xf32>, vector<2x1xf32> -> vector<2x3xf32>
    %30 = arith.addf %19, %29 : vector<2x3xf32>
    %c0_21 = arith.constant 0 : index
    %c0_22 = arith.constant 0 : index
    %c0_23 = arith.constant 0 : index
    %c0_24 = arith.constant 0 : index
    %31 = vector.load %arg5[%c0_21, %c0_22, %c0_23, %c0_24] : memref<1x1x2x3xf32, #tpu.memory_space<vmem>>, vector<1x1x2x3xf32>
    %32 = vector.shape_cast %31 : vector<1x1x2x3xf32> to vector<2x3xf32>
    %33 = vector.shape_cast %30 : vector<2x3xf32> to vector<1x1x2x3xf32>
    tpu.vector_store %arg5[%c0_21, %c0_22, %c0_23, %c0_24], %33 {strides = array<i32>} : memref<1x1x2x3xf32, #tpu.memory_space<vmem>>, vector<1x1x2x3xf32>,
    return
  }
  func.func @transform_0(%arg0: i32, %arg1: i32, %arg2: i32) -> (i32, i32, i32, i32) {
    %c1_i32 = arith.constant 1 : i32
    %0 = arith.muli %arg1, %c1_i32 : i32
    %1 = arith.addi %0, %arg2 : i32
    %c0_i32 = arith.constant 0 : i32
    %c0_i32_0 = arith.constant 0 : i32
    %c0_i32_1 = arith.constant 0 : i32
    return %arg0, %c0_i32, %1, %c0_i32_0 : i32, i32, i32, i32
  }
  func.func @transform_1(%arg0: i32, %arg1: i32, %arg2: i32) -> (i32, i32, i32, i32) {
    %c1_i32 = arith.constant 1 : i32
    %0 = arith.muli %arg1, %c1_i32 : i32
    %1 = arith.addi %0, %arg2 : i32
    %c0_i32 = arith.constant 0 : i32
    %c0_i32_0 = arith.constant 0 : i32
    %c0_i32_1 = arith.constant 0 : i32
    return %arg0, %c0_i32, %1, %c0_i32_0 : i32, i32, i32, i32
  }
  func.func @transform_2(%arg0: i32, %arg1: i32, %arg2: i32) -> (i32, i32, i32, i32) {
    %c0_i32 = arith.constant 0 : i32
    %c0_i32_0 = arith.constant 0 : i32
    %c0_i32_1 = arith.constant 0 : i32
    return %arg0, %arg1, %c0_i32, %c0_i32_0 : i32, i32, i32, i32
  }
}

</mosaic_0001>

<bundles_post_ra>
// kernel: asymmetric_focal_tversky_loss.1
= control target key start
LH: loop header
LB: loop body
LE: loop exit
PB: predicated region body
PF: predicated region fallthrough
CT: control target
= control target key end

     0   :  { %s499_s9 = smov 0   ;;  %s501_s10 = smov 0   ;;  %s548_s0 = inlined_call_operand.vmem [shape: f32[2,4,2,128], index: 0, kind: input, shape index: {}]   ;;  %s549_s1 = inlined_call_operand.vmem [shape: f32[2,4,2,128], index: 1, kind: input, shape index: {}]   ;;  %s550_s2 = inlined_call_operand.vmem [shape: f32[2,1,2,3], index: 2, kind: output, shape index: {}]  }
   0x1   :  { %s503_s11 = smov 0  }
   0x2 LB: > { %s31_s12 = sadd.s32 1, %s477_s10  ;;  %p424_p0 = scmp.ge.s32.totalorder %s481_s11, 1  ;;  %s481_s11 = sphi %s503_s11, %s12_s11   ;;  %s477_s10 = sphi %s501_s10, %s552_s10   ;;  %s473_s9 = sphi %s499_s9, %s551_s9  }
   0x3   : > { %p33_p1 = scmp.ge.s32.totalorder %s31_s12, 2  ;;  %p161_p2 = scmp.lt.s32.totalorder %s481_s11, 3 }
   0x5   : > { %s554_s12 = smov (%p33_p1, %s31_s12), 0  ;;  %p162_p3 = pnand %p424_p0, %p161_p2 }
   0x6   : > { %p199_p4 = scmp.lt.s32.totalorder (!%p162_p3), %s473_s9, 1 }
   0x7   : > { %165 = sbr.rel (%p162_p3) target bundleno = 185 (0xb9), region = 28 }
   0xc   : > { %s556_s9 = smov (!%p199_p4, %s473_s9), 1  ;;  %vm250_vm0 = vcmask 1041408   ;;  %vm267_vm1 = vcmask 1041409   ;;  %vm229_vm2 = vcmask 17408   ;;  %vm315_vm3 = vcmask 7168  }
   0xd   : > { %s432_s13 = sshll.u32 %s556_s9, 3  ;;  %s429_s20 = sshll.u32 %s556_s9, 1  ;;  %vm317_vm4 = vcmask 15360  }
   0xe   : > { %s206_s16 = scalar_lea.vmem %s548_s0, %s432_s13  ;;  %s216_s19 = scalar_lea.vmem %s549_s1, %s432_s13 }
   0xf   : > { %v231_v0 = vld [vmem:[%s206_s16] sm:$0x3]  ;;  %v232_v1 = vld [vmem:[%s206_s16 + $0x2] sm:$0x3]  ;;  %s224_s23 = scalar_lea.vmem %s550_s2, %s429_s20 }
  0x10   : > { %v233_v2 = vld [vmem:[%s216_s19] sm:$0x3]  ;;  %v234_v3 = vld [vmem:[%s216_s19 + $0x2] sm:$0x3]  ;;  %v235_v4 = vmax.f32 %v231_v0, 1e-07 }
  0x11   : > { %v236_v5 = vmax.f32 %v232_v1, 1e-07  ;;  %v245_v6 = vsub.f32 1.0, %v233_v2  ;;  %v246_v7 = vsub.f32 1.0, %v234_v3 }
  0x12   : > { %v237_v8 = vmin.f32 %v235_v4, 0.9999999 }
  0x13   : > { %v238_v9 = vmin.f32 %v236_v5, 0.9999999 }
  0x14   : > { %v239_v10 = vmul.f32 %v237_v8, %v233_v2  ;;  %v241_v12 = vsub.f32 1.0, %v237_v8  ;;  %v247_v14 = vmul.f32 %v245_v6, %v237_v8 }
  0x15   : > { %v240_v11 = vmul.f32 %v238_v9, %v234_v3  ;;  %v242_v13 = vsub.f32 1.0, %v238_v9  ;;  %v248_v15 = vmul.f32 %v246_v7, %v238_v9 }
  0x16   : > { %v251_v16 = vsel %vm250_vm0, %v239_v10, 0.0  ;;  %v243_v18 = vmul.f32 %v241_v12, %v233_v2  ;;  %v294_v22 = vsel %vm250_vm0, %v247_v14, 0.0  ;;  %v483_v2 = vmov 0.0  }
  0x17   : > { %v258_v17 = vsel %vm250_vm0, %v240_v11, 0.0  ;;  %v244_v19 = vmul.f32 %v242_v13, %v234_v3  ;;  %v252_v20 = vrot.slane %v251_v16, 4  ;;  %v301_v23 = vsel %vm250_vm0, %v248_v15, 0.0  ;;  %230 = vst.msk [vmem:[%s224_s23] sm:$0x3] %vm229_vm2, %v483_v2 }
  0x18   : > { %v259_v21 = vrot.slane %v258_v17, 4  ;;  %v273_v24 = vsel %vm250_vm0, %v243_v18, 0.0  ;;  %v295_v26 = vrot.slane %v294_v22, 4  ;;  %v302_v27 = vrot.slane %v301_v23, 4 }
  0x19   : > { %v280_v25 = vsel %vm250_vm0, %v244_v19, 0.0  ;;  %v253_v28 = vadd.f32 %v252_v20, %v251_v16  ;;  %v274_v30 = vrot.slane %v273_v24, 4 }
  0x1a   : > { %v260_v29 = vadd.f32 %v259_v21, %v258_v17  ;;  %v281_v31 = vrot.slane %v280_v25, 4  ;;  %v296_v32 = vadd.f32 %v295_v26, %v294_v22  ;;  %v303_v33 = vadd.f32 %v302_v27, %v301_v23 }
  0x1b   : > { %v254_v34 = vrot.slane %v253_v28, 2  ;;  %v275_v36 = vadd.f32 %v274_v30, %v273_v24 }
  0x1c   : > { %v261_v35 = vrot.slane %v260_v29, 2  ;;  %v282_v37 = vadd.f32 %v281_v31, %v280_v25  ;;  %v297_v38 = vrot.slane %v296_v32, 2  ;;  %v304_v39 = vrot.slane %v303_v33, 2 }
  0x1d   : > { %v255_v40 = vadd.f32 %v254_v34, %v253_v28  ;;  %v276_v42 = vrot.slane %v275_v36, 2 }
  0x1e   : > { %v262_v41 = vadd.f32 %v261_v35, %v260_v29  ;;  %v283_v43 = vrot.slane %v282_v37, 2  ;;  %v298_v44 = vadd.f32 %v297_v38, %v296_v32  ;;  %v305_v45 = vadd.f32 %v304_v39, %v303_v33  ;;  %v249_v6 = vld [vmem:[%s224_s23] sm:$0x3] }
  0x1f   : > { %v256_v46 = vrot.slane %v255_v40, 1  ;;  %v277_v48 = vadd.f32 %v276_v42, %v275_v36 }
  0x20   : > { %v263_v47 = vrot.slane %v262_v41, 1  ;;  %v284_v49 = vadd.f32 %v283_v43, %v282_v37  ;;  %v299_v50 = vrot.slane %v298_v44, 1  ;;  %v306_v51 = vrot.slane %v305_v45, 1 }
  0x21   : > { %v257_v52 = vadd.f32 %v256_v46, %v255_v40  ;;  %v278_v54 = vrot.slane %v277_v48, 1 }
  0x22   : > { %v264_v53 = vadd.f32 %v263_v47, %v262_v41  ;;  %v285_v55 = vrot.slane %v284_v49, 1  ;;  %v300_v56 = vadd.f32 %v299_v50, %v298_v44  ;;  %v307_v57 = vadd.f32 %v306_v51, %v305_v45 }
  0x23   : > { %v279_v59 = vadd.f32 %v278_v54, %v277_v48 }
  0x24   : > { %v268_v58 = vsel %vm267_vm1, %v264_v53, %v257_v52  ;;  %v286_v60 = vadd.f32 %v285_v55, %v284_v49  ;;  %v310_v62 = vsel %vm267_vm1, %v307_v57, %v300_v56 }
  0x25   : > { %v270_v61 = vsel %vm250_vm0, %v268_v58, 0.0  ;;  %v312_v0 = vsel %vm250_vm0, %v310_v62, 0.0 }
  0x26   : > { %271 = vadd.xlane.f32.xlu0 %v270_v61  ;;  %v289_v63 = vsel %vm267_vm1, %v286_v60, %v279_v59  ;;  %313 = vadd.xlane.f32.xlu1 %v312_v0 }
  0x27   : > { %v291_v1 = vsel %vm250_vm0, %v289_v63, 0.0 }
  0x2a   : > { %292 = vadd.xlane.f32.xlu0 %v291_v1 }
  0xaf   : > { %v272_v3 = vpop.xlane.xlu0 %271  ;;  %v314_v4 = vpop.xlane.xlu1 %313 }
  0xb3   : > { %v293_v5 = vpop.xlane.xlu0 %292 }
  0xb4   : > { %v316_v7 = vsel %vm315_vm3, %v272_v3, %v293_v5 }
  0xb5   : > { %v318_v8 = vsel %vm317_vm4, %v316_v7, %v314_v4 }
  0xb6   : > { %v319_v9 = vadd.f32 %v318_v8, %v249_v6 }
  0xb8   : > { %321 = vst.msk [vmem:[%s224_s23] sm:$0x3] %vm229_vm2, %v319_v9 }
  0xb9 PF: > { %s12_s11 = sadd.s32 1, %s481_s11   ;;  %s551_s9 = smov %s477_s10 }
  0xba   : > { %p9_p5 = scmp.ge.s32.totalorder %s12_s11, 4   ;;  %s552_s10 = smov %s554_s12 }
  0xbc   :  { %11 = sbr.rel (!%p9_p5) target bundleno = 2 (0x2), region = 65 }

</bundles_post_ra>
